<compile_context>
chip_gen: v6e
topology: v6e:2x2x1
jax: 0.10.0
libtpu: 0.0.40
codegen_flags: <defaults>
</compile_context>

<pallas_src>
import functools

import jax
import jax.numpy as jnp
from jax import lax
from jax.experimental import pallas as pl
from jax.experimental.pallas import tpu as pltpu

# Large finite negative fill for masked scores. torch uses -inf, which turns a
# fully-masked row into NaN; a finite fill gives identical results for any row
# with at least one unmasked key and a uniform (finite) row otherwise.
_MASK_FILL = -1e30


def _sdpa_kernel(*refs, inv_temperature, causal, has_mask, has_lengths,
                 return_attn, compute_in_bf16):
    idx = 0
    if has_lengths:
        lengths_ref = refs[idx]
        idx += 1
    q_ref, k_ref, v_ref = refs[idx:idx + 3]
    idx += 3
    mask_ref = None
    if has_mask:
        mask_ref = refs[idx]
        idx += 1
    out_ref = refs[idx]
    idx += 1
    attn_ref = refs[idx] if return_attn else None

    bt, lq_t, _ = q_ref.shape
    Lk = k_ref.shape[1]

    # Fold 1/temperature into q (Lq*D multiplies) instead of scaling the
    # (Lq, Lk) score matrix (Lq*Lk multiplies).
    q = q_ref[...] * jnp.asarray(inv_temperature, dtype=q_ref.dtype)
    k = k_ref[...]
    v = v_ref[...]

    if compute_in_bf16 and q_ref.dtype == jnp.float32:
        # Opt-in: MXU has no native f32 mode; run the matmuls in bf16 with f32 accum.
        q = q.astype(jnp.bfloat16)
        k = k.astype(jnp.bfloat16)
        v = v.astype(jnp.bfloat16)

    # Batched Q @ K^T without materializing a transpose: contraction over the
    # last dim of both operands (lowers to dot_general on the MXU), f32 accumulate.
    scores = jnp.einsum("bqd,bkd->bqk", q, k, preferred_element_type=jnp.float32)

    # ---- masking ----------------------------------------------------------
    if mask_ref is not None:
        m = mask_ref[...]  # int8, nonzero == masked; batch dim may be 1 (broadcast)
        scores = jnp.where(m != 0, _MASK_FILL, scores)

    if causal:
        # Generated in-kernel: zero HBM traffic, two iota compares on the VPU.
        q_pos = (pl.program_id(1) * lq_t
                 + lax.broadcasted_iota(jnp.int32, (1, lq_t, Lk), 1))
        k_pos = lax.broadcasted_iota(jnp.int32, (1, lq_t, Lk), 2)
        scores = jnp.where(k_pos > q_pos, _MASK_FILL, scores)

    if has_lengths:
        # Per-batch valid key lengths live in SMEM (scalar prefetch); build the
        # key-padding mask in-kernel instead of DMA'ing a dense tensor.
        b0 = pl.program_id(0) * bt
        k_pos = lax.broadcasted_iota(jnp.int32, (1, lq_t, Lk), 2)
        parts = [k_pos >= lengths_ref[b0 + i] for i in range(bt)]
        pad_mask = parts[0] if bt == 1 else jnp.concatenate(parts, axis=0)
        scores = jnp.where(pad_mask, _MASK_FILL, scores)

    # ---- numerically stable softmax over the key axis, all in f32 ----------
    mx = jnp.max(scores, axis=-1, keepdims=True)
    e = jnp.exp(scores - mx)
    denom = jnp.sum(e, axis=-1, keepdims=True)
    # EUP approximate reciprocal + one Newton-Raphson step: ~f32 accuracy, no divide,
    # and the reciprocal runs in the (otherwise idle) EUP slot next to the exp.
    r = pl.reciprocal(denom, approx=True)
    r = r * (2.0 - denom * r)
    attn = e * r

    # attn @ V on the MXU, f32 accumulate. Cast once; reuse for the store below.
    attn_lo = attn.astype(v.dtype)
    out = jnp.einsum("bqk,bkd->bqd", attn_lo, v,
                     preferred_element_type=jnp.float32)

    out_ref[...] = out.astype(out_ref.dtype)
    if attn_ref is not None:
        if attn_ref.dtype == attn_lo.dtype:
            attn_ref[...] = attn_lo          # reuse the existing cast
        else:
            attn_ref[...] = attn.astype(attn_ref.dtype)


def _vmem_budget_bytes():
    """~75% of physical VMEM for this generation (48 MiB v7x, 96 MiB v5e/v6e)."""
    cap = None
    try:
        cap = getattr(pltpu.get_tpu_info(), "vmem_capacity_bytes", None)
    except Exception:
        cap = None
    if not cap:
        cap = 64 * 1024 * 1024  # conservative fallback: v7x physical VMEM
    return int(cap * 0.75)


def scaled_dot_product_attention(q, k, v, mask=None, *, temperature,
                                 causal=False, key_lengths=None,
                                 return_attn=True, compute_in_bf16=False):
    """Pallas TPU implementation of ScaledDotProductAttention.forward.

    q: (B, Lq, D), k: (B, Lk, D), v: (B, Lk, Dv)
    mask: optional bool/int array of shape (Lq, Lk), (1, Lq, Lk) or (B, Lq, Lk);
          True / nonzero == masked (DMA'd as int8).
    causal: build a causal mask in-kernel (no HBM mask traffic).
    key_lengths: optional (B,) int array of valid key lengths; key positions
          >= length are masked, generated in-kernel from SMEM scalars.
    return_attn: when False the (B, Lq, Lk) attention matrix is neither stored
          nor returned (removes the dominant HBM writeback stream).
    Returns (output, attn) when return_attn else output.
    """
    B, Lq, D = q.shape
    Bk, Lk, Dk = k.shape
    Bv, Lkv, Dv = v.shape
    assert Bk == B and Bv == B and Dk == D and Lkv == Lk

    # ---- mask / length preprocessing --------------------------------------
    has_mask = mask is not None
    mask_i8 = None
    mask_bcast = False
    if has_mask:
        mask = jnp.asarray(mask)
        if mask.ndim == 2:
            mask = mask[None]
        mB = mask.shape[0]
        assert mask.shape[1:] == (Lq, Lk) and mB in (1, B)
        mask_i8 = (mask != 0).astype(jnp.int8)  # 4x less HBM traffic than f32
        mask_bcast = (mB == 1)

    has_lengths = key_lengths is not None
    if has_lengths:
        key_lengths = jnp.asarray(key_lengths, dtype=jnp.int32)
        assert key_lengths.shape == (B,)

    out_dtype = q.dtype  # torch dtype propagation: f32 in -> f32 out, bf16 -> bf16
    in_sz = q.dtype.itemsize
    out_sz = jnp.dtype(out_dtype).itemsize

    # ---- generation-aware VMEM budget and tile selection -------------------
    vmem_limit = _vmem_budget_bytes()
    footprint_cap = int(vmem_limit * 0.6)

    # Lq tile candidates: large, lane/sublane-legal divisors of Lq (512 first for
    # better HBM roofline on big sequences); full extent only as a last resort.
    lq_candidates = [c for c in (512, 256, 128, 64, 32, 16, 8) if Lq % c == 0]
    if not lq_candidates:
        lq_candidates = [Lq]  # odd Lq: full-extent block is always legal
    li = 0
    lq_t = lq_candidates[li]

    # Pack several batch elements per grid step for short sequences (amortizes the
    # ~0.35us per-step overhead and fills the MXU).
    bt = max(1, min(B, 256 // max(lq_t, 1)))
    while B % bt != 0:
        bt -= 1

    def _step_vmem_bytes(bt_, lq_t_):
        db = 2  # double-buffered pipeline blocks
        total = db * bt_ * lq_t_ * D * in_sz            # q
        total += db * bt_ * Lk * D * in_sz              # k
        total += db * bt_ * Lk * Dv * in_sz             # v
        if has_mask:
            mb = 1 if mask_bcast else bt_
            total += db * mb * lq_t_ * Lk * 1           # int8 mask
        total += db * bt_ * lq_t_ * Dv * out_sz         # output
        if return_attn:
            total += db * bt_ * lq_t_ * Lk * out_sz     # attn writeback
        total += 4 * bt_ * lq_t_ * Lk * 4               # f32 scores/e/attn temporaries
        return total

    # Footprint-aware shrink: lq_t first, then bt (keeps v7x's 64 MiB VMEM safe).
    while _step_vmem_bytes(bt, lq_t) > footprint_cap:
        if li + 1 < len(lq_candidates):
            li += 1
            lq_t = lq_candidates[li]
        elif bt > 1:
            bt -= 1
            while B % bt != 0:
                bt -= 1
        else:
            break

    # Guarantee >= 2 parallel grid steps so both v7x TensorCores (and the DMA
    # pipeline) engage even for tiny B / short Lq shapes.
    if B >= 2 and (B // bt) * (Lq // lq_t) < 2:
        bt = max(1, B // 2)
        while B % bt != 0:
            bt -= 1

    grid = (B // bt, Lq // lq_t)  # b outer, qi inner: K/V blocks stay resident over qi

    # ---- specs --------------------------------------------------------------
    in_specs = [
        pl.BlockSpec((bt, lq_t, D), lambda b, qi, *_: (b, qi, 0)),
        pl.BlockSpec((bt, Lk, D), lambda b, qi, *_: (b, 0, 0)),
        pl.BlockSpec((bt, Lk, Dv), lambda b, qi, *_: (b, 0, 0)),
    ]
    args = [q, k, v]
    if has_mask:
        if mask_bcast:
            # Batch-broadcast mask: one (1, lq_t, Lk) int8 block per Lq tile.
            in_specs.append(pl.BlockSpec((1, lq_t, Lk), lambda b, qi, *_: (0, qi, 0)))
        else:
            in_specs.append(pl.BlockSpec((bt, lq_t, Lk), lambda b, qi, *_: (b, qi, 0)))
        args.append(mask_i8)

    out_shapes = [jax.ShapeDtypeStruct((B, Lq, Dv), out_dtype)]
    out_specs = [pl.BlockSpec((bt, lq_t, Dv), lambda b, qi, *_: (b, qi, 0))]
    if return_attn:
        out_shapes.append(jax.ShapeDtypeStruct((B, Lq, Lk), out_dtype))
        out_specs.append(pl.BlockSpec((bt, lq_t, Lk), lambda b, qi, *_: (b, qi, 0)))

    kernel = functools.partial(
        _sdpa_kernel,
        inv_temperature=1.0 / float(temperature),
        causal=causal,
        has_mask=has_mask,
        has_lengths=has_lengths,
        return_attn=return_attn,
        compute_in_bf16=compute_in_bf16,
    )

    if has_lengths:
        grid_spec = pltpu.PrefetchScalarGridSpec(
            num_scalar_prefetch=1, grid=grid,
            in_specs=in_specs, out_specs=out_specs)
        call_args = [key_lengths] + args
    else:
        grid_spec = pltpu.PrefetchScalarGridSpec(
            num_scalar_prefetch=0, grid=grid,
            in_specs=in_specs, out_specs=out_specs)
        call_args = args

    results = pl.pallas_call(
        kernel,
        out_shape=tuple(out_shapes),
        grid_spec=grid_spec,
        compiler_params=pltpu.CompilerParams(
            # Two independent axes: batch tiles x Lq tiles -> both TCs busy on v7x.
            dimension_semantics=("parallel", "parallel"),
            vmem_limit_bytes=vmem_limit,
        ),
    )(*call_args)

    if return_attn:
        out, attn = results
        return out, attn
    (out,) = results
    return out


def _reference(q, k, v, mask, temperature):
    attn = jnp.einsum("bqd,bkd->bqk", q, k) / temperature
    if mask is not None:
        if mask.ndim == 2:
            mask = mask[None]
        attn = jnp.where(mask, -jnp.inf, attn)
    attn = jax.nn.softmax(attn, axis=-1)
    out = jnp.einsum("bqk,bkd->bqd", attn, v)
    return out, attn


if __name__ == "__main__":
    # Small shapes consistent with the module: batch=2, seq=8, hidden=32.
    B, Lq, Lk, D, Dv = 2, 8, 8, 32, 32
    temperature = float(D) ** 0.5

    key = jax.random.PRNGKey(0)
    kq, kk, kv = jax.random.split(key, 3)
    q = jax.random.normal(kq, (B, Lq, D), dtype=jnp.float32)
    k = jax.random.normal(kk, (B, Lk, D), dtype=jnp.float32)
    v = jax.random.normal(kv, (B, Lk, Dv), dtype=jnp.float32)

    ok = True

    # Case 1: causal mask generated in-kernel (no mask DMA at all).
    out1, attn1 = scaled_dot_product_attention(q, k, v, causal=True,
                                               temperature=temperature)
    jax.block_until_ready((out1, attn1))
    causal_mask = jnp.triu(jnp.ones((Lq, Lk), dtype=bool), k=1)
    r_out1, r_attn1 = _reference(q, k, v, causal_mask, temperature)
    ok &= bool(jnp.allclose(out1, r_out1, atol=1e-4, rtol=1e-4))
    ok &= bool(jnp.allclose(attn1, r_attn1, atol=1e-4, rtol=1e-4))

    # Case 2: per-batch key-padding via SMEM-resident lengths (scalar prefetch).
    lengths = jnp.array([Lk, Lk - 3], dtype=jnp.int32)
    out2, attn2 = scaled_dot_product_attention(q, k, v, key_lengths=lengths,
                                               temperature=temperature)
    jax.block_until_ready((out2, attn2))
    pad_mask = jnp.arange(Lk)[None, None, :] >= lengths[:, None, None]
    pad_mask = jnp.broadcast_to(pad_mask, (B, Lq, Lk))
    r_out2, r_attn2 = _reference(q, k, v, pad_mask, temperature)
    ok &= bool(jnp.allclose(out2, r_out2, atol=1e-4, rtol=1e-4))
    ok &= bool(jnp.allclose(attn2, r_attn2, atol=1e-4, rtol=1e-4))

    # Case 3: dense per-batch boolean mask (original module semantics, int8 DMA).
    out3, attn3 = scaled_dot_product_attention(q, k, v, pad_mask,
                                               temperature=temperature)
    jax.block_until_ready((out3, attn3))
    ok &= bool(jnp.allclose(out3, r_out2, atol=1e-4, rtol=1e-4))
    ok &= bool(jnp.allclose(attn3, r_attn2, atol=1e-4, rtol=1e-4))

    # Case 4: 2-D broadcast dense mask, attn output disabled (no attn writeback).
    out4 = scaled_dot_product_attention(q, k, v, causal_mask,
                                        temperature=temperature,
                                        return_attn=False)
    jax.block_until_ready(out4)
    ok &= bool(jnp.allclose(out4, r_out1, atol=1e-4, rtol=1e-4))

    # Case 5: no mask at all.
    out5, attn5 = scaled_dot_product_attention(q, k, v, None,
                                               temperature=temperature)
    jax.block_until_ready((out5, attn5))
    r_out5, r_attn5 = _reference(q, k, v, None, temperature)
    ok &= bool(jnp.allclose(out5, r_out5, atol=1e-4, rtol=1e-4))
    ok &= bool(jnp.allclose(attn5, r_attn5, atol=1e-4, rtol=1e-4))

    assert ok, "mismatch vs reference"
    print("KERNEL_OK")
</pallas_src>

<mosaic_0001>
module attributes {stable_mosaic.version = 11 : i64} {
  func.func @_sdpa_kernel(%arg0: i32, %arg1: i32, %arg2: memref<1x8x32xf32, #tpu.memory_space<vmem>>, %arg3: memref<1x8x32xf32, #tpu.memory_space<vmem>>, %arg4: memref<1x8x32xf32, #tpu.memory_space<vmem>>, %arg5: memref<1x8x32xf32, #tpu.memory_space<vmem>>, %arg6: memref<1x8x8xf32, #tpu.memory_space<vmem>>) attributes {dimension_semantics = [#tpu.dimension_semantics<parallel>, #tpu.dimension_semantics<parallel>], iteration_bounds = array<i64: 2, 1>, scalar_prefetch = 0 : i64, scratch_operands = 0 : i64, tpu.core_type = #tpu.core_type<tc>, window_params = [{transform_indices = @transform_0, window_bounds = array<i64: 1, 8, 32>}, {transform_indices = @transform_1, window_bounds = array<i64: 1, 8, 32>}, {transform_indices = @transform_2, window_bounds = array<i64: 1, 8, 32>}, {transform_indices = @transform_3, window_bounds = array<i64: 1, 8, 32>}, {transform_indices = @transform_4, window_bounds = array<i64: 1, 8, 8>}]} {
    %c0 = arith.constant 0 : index
    %c0_0 = arith.constant 0 : index
    %c0_1 = arith.constant 0 : index
    %0 = vector.load %arg2[%c0, %c0_0, %c0_1] : memref<1x8x32xf32, #tpu.memory_space<vmem>>, vector<1x8x32xf32>
    %cst = arith.constant 0.176776692 : f32
    %1 = vector.broadcast %cst : f32 to vector<1x8x32xf32>
    %2 = arith.mulf %0, %1 : vector<1x8x32xf32>
    %c0_2 = arith.constant 0 : index
    %c0_3 = arith.constant 0 : index
    %c0_4 = arith.constant 0 : index
    %3 = vector.load %arg3[%c0_2, %c0_3, %c0_4] : memref<1x8x32xf32, #tpu.memory_space<vmem>>, vector<1x8x32xf32>
    %c0_5 = arith.constant 0 : index
    %c0_6 = arith.constant 0 : index
    %c0_7 = arith.constant 0 : index
    %4 = vector.load %arg4[%c0_5, %c0_6, %c0_7] : memref<1x8x32xf32, #tpu.memory_space<vmem>>, vector<1x8x32xf32>
    "tpu.trace_start"() <{level = 10 : i32, message = "bqd,bkd->bqk"}> : () -> ()
    %cst_8 = arith.constant dense<0.000000e+00> : vector<1x8x8xf32>
    %5 = tpu.matmul %2, %3, %cst_8 {dimension_numbers = #tpu.dot_dimension_numbers<[2], [2], [1], [1], [0, 0, 0, 1, 1, 1], [0], [0]>} : vector<1x8x32xf32>, vector<1x8x32xf32>, vector<1x8x8xf32> -> vector<1x8x8xf32>
    "tpu.trace_stop"() : () -> ()
    %c8_i32 = arith.constant 8 : i32
    %6 = arith.muli %arg1, %c8_i32 : i32
    %7 = tpu.iota {dimensions = array<i32: 1>} : vector<1x8x8xi32>
    %8 = vector.broadcast %6 : i32 to vector<1x8x8xi32>
    %9 = arith.addi %8, %7 : vector<1x8x8xi32>
    %10 = tpu.iota {dimensions = array<i32: 2>} : vector<1x8x8xi32>
    %11 = arith.cmpi sgt, %10, %9 : vector<1x8x8xi32>
    %cst_9 = arith.constant -1.000000e+30 : f32
    %12 = vector.broadcast %cst_9 : f32 to vector<1x8x8xf32>
    %13 = arith.select %11, %12, %5 : vector<1x8x8xi1>, vector<1x8x8xf32>
    %cst_10 = arith.constant dense<0xFF800000> : vector<1x8xf32>
    %14 = vector.multi_reduction <maximumf>, %13, %cst_10 [2] : vector<1x8x8xf32> to vector<1x8xf32>
    %15 = vector.shape_cast %14 : vector<1x8xf32> to vector<1x8x1xf32>
    %16 = vector.broadcast %15 : vector<1x8x1xf32> to vector<1x8x8xf32>
    %17 = arith.subf %13, %16 : vector<1x8x8xf32>
    %18 = math.exp %17 : vector<1x8x8xf32>
    %cst_11 = arith.constant dense<0.000000e+00> : vector<1x8xf32>
    %19 = vector.multi_reduction <add>, %18, %cst_11 [2] : vector<1x8x8xf32> to vector<1x8xf32>
    %20 = vector.shape_cast %19 : vector<1x8xf32> to vector<1x8x1xf32>
    %21 = tpu.reciprocal %20 {approx = true} : vector<1x8x1xf32> -> vector<1x8x1xf32>
    %22 = arith.mulf %20, %21 : vector<1x8x1xf32>
    %cst_12 = arith.constant 2.000000e+00 : f32
    %23 = vector.broadcast %cst_12 : f32 to vector<1x8x1xf32>
    %24 = arith.subf %23, %22 : vector<1x8x1xf32>
    %25 = arith.mulf %21, %24 : vector<1x8x1xf32>
    %26 = vector.broadcast %25 : vector<1x8x1xf32> to vector<1x8x8xf32>
    %27 = arith.mulf %18, %26 : vector<1x8x8xf32>
    "tpu.trace_start"() <{level = 10 : i32, message = "bqk,bkd->bqd"}> : () -> ()
    %cst_13 = arith.constant dense<0.000000e+00> : vector<1x8x32xf32>
    %28 = tpu.matmul %27, %4, %cst_13 {dimension_numbers = #tpu.dot_dimension_numbers<[2], [1], [1], [2], [0, 0, 0, 1, 1, 2], [0], [0]>} : vector<1x8x8xf32>, vector<1x8x32xf32>, vector<1x8x32xf32> -> vector<1x8x32xf32>
    "tpu.trace_stop"() : () -> ()
    %c0_14 = arith.constant 0 : index
    %c0_15 = arith.constant 0 : index
    %c0_16 = arith.constant 0 : index
    %29 = vector.load %arg5[%c0_14, %c0_15, %c0_16] : memref<1x8x32xf32, #tpu.memory_space<vmem>>, vector<1x8x32xf32>
    tpu.vector_store %arg5[%c0_14, %c0_15, %c0_16], %28 {strides = array<i32>} : memref<1x8x32xf32, #tpu.memory_space<vmem>>, vector<1x8x32xf32>,
    %c0_17 = arith.constant 0 : index
    %c0_18 = arith.constant 0 : index
    %c0_19 = arith.constant 0 : index
    %30 = vector.load %arg6[%c0_17, %c0_18, %c0_19] : memref<1x8x8xf32, #tpu.memory_space<vmem>>, vector<1x8x8xf32>
    tpu.vector_store %arg6[%c0_17, %c0_18, %c0_19], %27 {strides = array<i32>} : memref<1x8x8xf32, #tpu.memory_space<vmem>>, vector<1x8x8xf32>,
    return
  }
  func.func @transform_0(%arg0: i32, %arg1: i32) -> (i32, i32, i32) {
    %c0_i32 = arith.constant 0 : i32
    %c0_i32_0 = arith.constant 0 : i32
    return %arg0, %arg1, %c0_i32 : i32, i32, i32
  }
  func.func @transform_1(%arg0: i32, %arg1: i32) -> (i32, i32, i32) {
    %c0_i32 = arith.constant 0 : i32
    %c0_i32_0 = arith.constant 0 : i32
    %c0_i32_1 = arith.constant 0 : i32
    return %arg0, %c0_i32, %c0_i32_0 : i32, i32, i32
  }
  func.func @transform_2(%arg0: i32, %arg1: i32) -> (i32, i32, i32) {
    %c0_i32 = arith.constant 0 : i32
    %c0_i32_0 = arith.constant 0 : i32
    %c0_i32_1 = arith.constant 0 : i32
    return %arg0, %c0_i32, %c0_i32_0 : i32, i32, i32
  }
  func.func @transform_3(%arg0: i32, %arg1: i32) -> (i32, i32, i32) {
    %c0_i32 = arith.constant 0 : i32
    %c0_i32_0 = arith.constant 0 : i32
    return %arg0, %arg1, %c0_i32 : i32, i32, i32
  }
  func.func @transform_4(%arg0: i32, %arg1: i32) -> (i32, i32, i32) {
    %c0_i32 = arith.constant 0 : i32
    %c0_i32_0 = arith.constant 0 : i32
    return %arg0, %arg1, %c0_i32 : i32, i32, i32
  }
}

</mosaic_0001>

<bundles_post_ra>
// kernel: tpu_custom_call.1
= control target key start
LH: loop header
LB: loop body
LE: loop exit
PB: predicated region body
PF: predicated region fallthrough
CT: control target
= control target key end

     0   :  { %s1276_s0 = inlined_call_operand.hbm [shape: f32[2,8,32], index: 0, kind: input, shape index: {}]   ;;  %s1277_s1 = inlined_call_operand.hbm [shape: f32[2,8,32], index: 1, kind: input, shape index: {}]   ;;  %s1278_s2 = inlined_call_operand.hbm [shape: f32[2,8,32], index: 2, kind: input, shape index: {}]   ;;  %s1279_s3 = inlined_call_operand.hbm [shape: f32[2,8,32], index: 3, kind: output, shape index: {0}]   ;;  %s1280_s4 = inlined_call_operand.hbm [shape: f32[2,8,8], index: 4, kind: output, shape index: {1}]  }
   0x1   :  { %1284 = sst [smem:[#allocation18_spill]] %s1277_s1 }
   0x2   :  { %10 = vsyncpa [#allocation3], 0 }
   0x3   :  { %12 = vsyncpa [#allocation3 + $0x1], 0 }
   0x4   :  { %13 = vsyncpa [#allocation6], 0 }
   0x5   :  { %15 = vsyncpa [#allocation6 + $0x1], 0 }
   0x6   :  { %16 = vsyncpa [#allocation4], 0 }
   0x7   :  { %18 = vsyncpa [#allocation4 + $0x1], 0 }
   0x8   :  { %19 = vsyncpa [#allocation10], 0 }
   0x9   :  { %21 = vsyncpa [#allocation10 + $0x1], 0  ;;  %s1038_s15 = smov 0   ;;  %s1040_s16 = smov 0  }
   0xa   :  { %s1042_s17 = smov 0   ;;  %s1044_s18 = smov 0  }
   0xb   :  { %s1046_s19 = smov 0   ;;  %s1048_s20 = smov 0  }
   0xc LB: > { %1285 = sst [smem:[#allocation15_spill]] %s1000_s19  ;;  %s1069_s21 = sadd.s32 4294967295, %s1004_s20   ;;  %s1004_s20 = sphi %s1048_s20, %s27_s20   ;;  %s1000_s19 = sphi %s1046_s19, %s1299_s19   ;;  %s996_s18 = sphi %s1044_s18, %s1298_s18   ;;  %s992_s17 = sphi %s1042_s17, %s1302_s17   ;;  %s988_s16 = sphi %s1040_s16, %s1301_s16   ;;  %s984_s15 = sphi %s1038_s15, %s1300_s15  }
   0xd   : > { %s685_s22 = sadd.s32 4294967294, %s1004_s20   ;;  %s39_s23 = sadd.s32 1, %s1000_s19 }
   0xe   : > { %s48_s24 = sadd.s32 1, %s992_s17  ;;  %p41_p0 = scmp.ge.s32.totalorder %s39_s23, 2 }
   0xf   : > { %p55_p1 = scmp.ne.s32.totalorder %s992_s17, %s988_s16  ;;  %p56_p2 = scmp.eq.s32.totalorder %s1004_s20, 0 }
  0x10   : > { %p61_p3 = scmp.ne.s32.totalorder %s988_s16, %s984_s15  ;;  %s1304_s23 = smov (%p41_p0, %s39_s23), 0 }
  0x11   : > { %1286 = sst [smem:[#allocation16_spill]] %s1304_s23  ;;  %p1081_p4 = por %p56_p2, %p55_p1 }
  0x12   : > { %p62_p5 = scmp.eq.s32.totalorder %s1069_s21, 0  ;;  %s43_s26 = ssub.s32 %s1000_s19, %s1304_s23 }
  0x13   : > { %p139_p6 = scmp.eq.s32.totalorder %s1069_s21, 1  ;;  %p46_p7 = scmp.eq.s32.totalorder %s43_s26, 0 }
  0x14   : > { %p1089_p8 = por %p62_p5, %p61_p3  ;;  %p145_p10 = scmp.eq.s32.totalorder %s685_s22, 1 }
  0x15   : > { %p1093_p9 = por %p139_p6, %p55_p1  ;;  %p750_p13 = scmp.lt.s32.totalorder %s1004_s20, 2 }
  0x16   : > { %s1098_s29 = scalar_select %p46_p7, %s992_s17, %s48_s24  }
  0x17   : > { %p1100_p11 = por %p145_p10, %p61_p3  ;;  %s1281_s5 = sand.u32 1, %s992_s17  }
  0x18   : > { %1290 = sst [smem:[#allocation17_spill]] %s1098_s29  ;;  %s1109_s6 = sshll.u32 %s1281_s5, 3 }
  0x19   : > { %s1112_s7 = sshll.u32 %s1000_s19, 7  ;;  %p1116_p0 = pnand %p750_p13, %p1081_p4 }
  0x1a   : > { %s212_s9 = sand.u32 1, %s1004_s20   ;;  %s1293_s1 = sld [smem:[#allocation18_spill]] }
  0x1b   : > { %s216_s13 = scalar_lea.vmem [#allocation5], %s1109_s6  ;;  %p694_p1 = scmp.ge.s32.totalorder %s1004_s20, 1 }
  0x1c   : > { %s223_s14 = sshll.u32 %s216_s13, 4  ;;  %p246_p2 = scmp.lt.s32.totalorder %s1004_s20, 3  ;;  %s224_s14 = int_to_ptr.vmem [resolvable:$true] %s223_s14 }
  0x1d   : > { %s1128_s22 = scalar_lea.sflag [#allocation6], %s212_s9  ;;  %p808_p3 = pneg %p1116_p0 }
  0x1e   : > { %s819_s24 = scalar_lea.vmem %s224_s14, 128  ;;  %s1006_s25 = smov [#allocation5]  }
  0x1f   : > { %p820_p4 = scmp.ne.s32.totalorder %s224_s14, %s819_s24  ;;  %s824_s26 = sshll.u32 %s1006_s25, 4  ;;  %s825_s26 = int_to_ptr.vmem [resolvable:$false] %s824_s26 }
  0x20   : > { %s221_s12 = scalar_lea.hbm %s1293_s1, %s1112_s7  ;;  %s826_s10 = scalar_lea.vmem %s825_s26, 256 }
  0x21   : > { %p822_p5 = pnand %p820_p4, %p808_p3  ;;  %p827_p7 = scmp.lt.s32.totalorder %s224_s14, %s825_s26 }
  0x22   : > { %p828_p10 = scmp.lt.s32.totalorder %s826_s10, %s819_s24 }
  0x23   : > { %p823_p6 = pneg %p822_p5 }
  0x24   : > { %p829_p13 = por %p828_p10, %p827_p7 }
  0x26   : > { %p830_p12 = pnand %p829_p13, %p823_p6 }
  0x28   : > { %833 = shalt.err (!%p830_p12)
}
  0x29   : > { %739 = dma.hbm_to_vmem [thread:$0]  (!%p1116_p0), %s221_s12, 128, %s224_s14, %s1128_s22  }
  0x2a   : > { %p1142_p4 = pnand %p694_p1, %p246_p2  ;;  %s203_s24 = scalar_lea.hbm %s1276_s0, %s1112_s7 }
  0x2b   : > { %s197_s25 = scalar_lea.vmem [#allocation2], %s1109_s6  ;;  %s239_s1 = scalar_lea.hbm %s1278_s2, %s1112_s7 }
  0x2c   : > { %s205_s26 = sshll.u32 %s197_s25, 4  ;;  %s1295_s23 = sand.u32 1, %s992_s17   ;;  %s206_s26 = int_to_ptr.vmem [resolvable:$true] %s205_s26 }
  0x2d   : > { %s194_s19 = scalar_lea.sflag [#allocation3], %s1295_s23  ;;  %s847_s12 = scalar_lea.vmem %s206_s26, 128 }
  0x2e   : > { %p848_p12 = scmp.ne.s32.totalorder %s206_s26, %s847_s12  ;;  %s1007_s14 = smov [#allocation2]  }
  0x2f   : > { %s852_s29 = sshll.u32 %s1007_s14, 4  ;;  %s853_s29 = int_to_ptr.vmem [resolvable:$false] %s852_s29 }
  0x30   : > { %p850_p1 = pnand %p848_p12, %p808_p3  ;;  %s854_s11 = scalar_lea.vmem %s853_s29, 256 }
  0x31   : > { %p855_p5 = scmp.lt.s32.totalorder %s206_s26, %s853_s29  ;;  %p856_p6 = scmp.lt.s32.totalorder %s854_s11, %s847_s12 }
  0x32   : > { %p851_p2 = pneg %p850_p1 }
  0x33   : > { %p857_p7 = por %p856_p6, %p855_p5 }
  0x35   : > { %p858_p10 = pnand %p857_p7, %p851_p2 }
  0x37   : > { %861 = shalt.err (!%p858_p10)
}
  0x38   : > { %736 = dma.hbm_to_vmem [thread:$0]  (!%p1116_p0), %s203_s24, 128, %s206_s26, %s194_s19  }
  0x39   : > { %s234_s23 = scalar_lea.vmem [#allocation7], %s1109_s6  ;;  %s1008_s25 = smov [#allocation7]  }
  0x3a   : > { %s241_s5 = sshll.u32 %s234_s23, 4  ;;  %s880_s29 = sshll.u32 %s1008_s25, 4  ;;  %s242_s5 = int_to_ptr.vmem [resolvable:$true] %s241_s5  ;;  %s881_s29 = int_to_ptr.vmem [resolvable:$false] %s880_s29 }
  0x3b   : > { %s875_s13 = scalar_lea.vmem %s242_s5, 128  ;;  %s882_s10 = scalar_lea.vmem %s881_s29, 256 }
  0x3c   : > { %p876_p13 = scmp.ne.s32.totalorder %s242_s5, %s875_s13  ;;  %p883_p2 = scmp.lt.s32.totalorder %s242_s5, %s881_s29 }
  0x3d   : > { %p884_p5 = scmp.lt.s32.totalorder %s882_s10, %s875_s13 }
  0x3e   : > { %p878_p12 = pnand %p876_p13, %p808_p3 }
  0x3f   : > { %p885_p6 = por %p884_p5, %p883_p2 }
  0x40   : > { %p879_p1 = pneg %p878_p12 }
  0x42   : > { %p886_p7 = pnand %p885_p6, %p879_p1 }
  0x44   : > { %889 = shalt.err (!%p886_p7)
}
  0x45   : > { %742 = dma.hbm_to_vmem [thread:$0]  (!%p1116_p0), %s239_s1, 128, %s242_s5, %s1128_s22  }
  0x46   : > { %250 = sbr.rel (%p1142_p4) target bundleno = 804 (0x324), region = 32  ;;  %s1177_s24 = sand.u32 (!%p1142_p4), 1, %s988_s16  }
  0x47   : > { %s1180_s26 = sshll.u32 (!%p1142_p4), %s1177_s24, 3  ;;  %s253_s8 = scalar_lea.sflag (!%p1142_p4), [#allocation3], %s1177_s24 }
  0x48   : > { %s256_s12 = scalar_lea.vmem (!%p1142_p4), [#allocation2], %s1180_s26 }
  0x4b   : > { %967 = dma.done.wait (%p1089_p8), %s253_s8, 128  }
  0x4c   : > { %969 = vsyncadd (%p1089_p8), %s253_s8, 4294967168  ;;  %s261_s1 = sand.u32 1, %s1069_s21   ;;  %s265_s22 = scalar_lea.vmem [#allocation5], %s1180_s26 }
  0x4d   : > { %s262_s7 = scalar_lea.sflag [#allocation6], %s261_s1 }
  0x4e   : > { %971 = dma.done.wait (%p1089_p8), %s262_s7, 256  }
  0x4f   : > { %973 = vsyncadd (%p1089_p8), %s262_s7, 4294967040  ;;  %v1009_v0 = vmov 0.0   ;;  %vm1010_vm0 = vmmov 0   ;;  %vm318_vm1 = vcmask 261120   ;;  %v316_v1 = vld [vmem:[%s265_s22] sm:$0xff]  ;;  %v314_v2 = vld [vmem:[%s256_s12] sm:$0xff]  ;;  %v396_v4 = vlaneseq }
  0x50   : > { %713 = vmatprep.subr.mxu0 %v1009_v0  ;;  %715 = vmatprep.mubr.msk.f32.mxu0 %vm1010_vm0, %v1009_v0  ;;  %v315_v3 = vmul.f32 0.17677669, %v314_v2  ;;  %vm404_vm3 = vcmask 64512   ;;  %s274_s21 = scalar_lea.vmem [#allocation7], %s1180_s26  ;;  %s313_s27 = scalar_lea.vmem [#allocation9], %s1180_s26 }
  0x51   : > { %718 = vmatprep.subr.mxu1 %v1009_v0  ;;  %720 = vmatprep.mubr.msk.f32.mxu1 %vm1010_vm0, %v1009_v0  ;;  %v397_v5 = vshrl.u32 %v396_v4, 7  ;;  %v401_v6 = vand.u32 127, %v396_v4  ;;  %v317_v16 = vld [vmem:[%s274_s21] sm:$0xff]  ;;  %s705_s9 = sshll.u32 %s996_s18, 7  ;;  %s528_s5 = sshll.u32 %s313_s27, 4  ;;  %s529_s5 = int_to_ptr.vmem [resolvable:$true] %s528_s5 }
  0x52   : > { %714 = vmatpush3.xpose.msk.msra.mxu0 %vm318_vm1, %v316_v1  ;;  %719 = vmatpush3.msra.mxu1 %v317_v16  ;;  %s526_s23 = scalar_lea.hbm %s1280_s4, %s705_s9  ;;  %s500_s13 = scalar_lea.sflag [#allocation10], %s1177_s24 }
  0x53   : > { %vm402_vm2 = vcmp.gt.s32.totalorder %v401_v6, %v397_v5  ;;  %s890_s25 = scalar_lea.vmem %s529_s5, 128  ;;  %s1011_s29 = smov [#allocation9]  }
  0x54   : > { %p891_p8 = scmp.ne.s32.totalorder %s529_s5, %s890_s25  ;;  %s894_s10 = sshll.u32 %s1011_s29, 4  ;;  %s895_s10 = int_to_ptr.vmem [resolvable:$false] %s894_s10 }
  0x55   : > { %716 = vmatmul.mubr.msk.f32.vlgmr.msra.gmra.mxu0 %vm318_vm1, %v315_v3  ;;  %s896_s19 = scalar_lea.vmem %s895_s10, 256  ;;  %p897_p4 = scmp.lt.s32.totalorder %s529_s5, %s895_s10 }
  0x56   : > { %p892_p0 = pnand %p891_p8, %p1093_p9  ;;  %p898_p10 = scmp.lt.s32.totalorder %s896_s19, %s890_s25 }
  0x58   : > { %p893_p3 = pneg %p892_p0  ;;  %p899_p13 = por %p898_p10, %p897_p4 }
  0x5a   : > { %p900_p12 = pnand %p899_p13, %p893_p3 }
 0x115   : > { %v391_v7 = vpop.f32.mrf.mxu0 }
 0x116   : > { %v403_v8 = vsel %vm402_vm2, -1e+30, %v391_v7 }
 0x117   : > { %v717_v9 = vpop.f32.mrf.mxu0  ;;  %v405_v10 = vsel %vm404_vm3, %v403_v8, -inf }
 0x118   : > { %406 = vmax.xlane.f32.xlu0 %v405_v10 }
 0x1a1   : > { %v407_v11 = vpop.xlane.xlu0 %406 }
 0x1a2   : > { %v408_v12 = vsub.f32 %v403_v8, %v407_v11 }
 0x1a4   : > { %v409_v13 = vmul.f32 1.442695, %v408_v12 }
 0x1a6   : > { %802 = vpow2.f32 %v409_v13 }
 0x1b3   : > { %v803_v14 = vpop.eup %802 }
 0x1b4   : > { %v411_v15 = vsel %vm404_vm3, %v803_v14, 0.0 }
 0x1b5   : > { %412 = vadd.xlane.f32.xlu0 %v411_v15 }
 0x23e   : > { %v413_v17 = vpop.xlane.xlu0 %412 }
 0x23f   : > { %804 = vrcp.f32 %v413_v17 }
 0x24c   : > { %v805_v18 = vpop.eup %804 }
 0x24d   : > { %v415_v19 = vmul.f32 %v805_v18, %v413_v17 }
 0x24f   : > { %v416_v20 = vsub.f32 2.0, %v415_v19 }
 0x251   : > { %v417_v21 = vmul.f32 %v805_v18, %v416_v20 }
 0x253   : > { %v418_v22 = vmul.f32 %v803_v14, %v417_v21 }
 0x255   : > { %721 = vmatmul.mubr.msk.f32.vlgmr.msra.gmra.mxu1 %vm404_vm3, %v418_v22  ;;  %493 = vst.msk [vmem:[%s313_s27] sm:$0xff] %vm404_vm3, %v418_v22 }
 0x256   : > { %903 = shalt.err (!%p900_p12)
}
 0x257   : > { %s904_s6 = scalar_lea.hbm %s526_s23, 128  ;;  %s908_s1 = scalar_lea.hbm %s1280_s4, 256 }
 0x258   : > { %p905_p1 = scmp.ne.s32.totalorder %s526_s23, %s904_s6  ;;  %p909_p6 = scmp.lt.s32.totalorder %s526_s23, %s1280_s4 }
 0x259   : > { %p910_p7 = scmp.lt.s32.totalorder %s908_s1, %s904_s6 }
 0x25a   : > { %p906_p2 = pnand %p905_p1, %p1093_p9 }
 0x25b   : > { %p911_p8 = por %p910_p7, %p909_p6 }
 0x25c   : > { %p907_p5 = pneg %p906_p2 }
 0x25e   : > { %p912_p0 = pnand %p911_p8, %p907_p5 }
 0x260   : > { %915 = shalt.err (!%p912_p0)
}
 0x261   : > { %730 = dma.vmem_to_hbm [thread:$0]  (%p1093_p9), %s529_s5, 128, %s526_s23, %s500_s13  }
 0x262   : > { %s306_s21 = scalar_lea.vmem [#allocation8], %s1180_s26  ;;  %s1227_s25 = scalar_lea.hbm %s1279_s3, %s705_s9 }
 0x263   : > { %s514_s27 = sshll.u32 %s306_s21, 4  ;;  %s495_s29 = scalar_lea.sflag [#allocation4], %s1177_s24  ;;  %s1229_s27 = int_to_ptr.vmem [resolvable:$true] %s514_s27 }
 0x264   : > { %s916_s10 = scalar_lea.vmem %s1229_s27, 128  ;;  %s1012_s18 = smov [#allocation8]  }
 0x265   : > { %p917_p3 = scmp.ne.s32.totalorder %s1229_s27, %s916_s10  ;;  %s920_s26 = sshll.u32 %s1012_s18, 4  ;;  %s921_s26 = int_to_ptr.vmem [resolvable:$false] %s920_s26 }
 0x266   : > { %s922_s9 = scalar_lea.vmem %s921_s26, 256  ;;  %p923_p13 = scmp.lt.s32.totalorder %s1229_s27, %s921_s26 }
 0x267   : > { %p918_p4 = pnand %p917_p3, %p1093_p9  ;;  %p924_p12 = scmp.lt.s32.totalorder %s922_s9, %s916_s10 }
 0x269   : > { %p919_p10 = pneg %p918_p4  ;;  %p925_p1 = por %p924_p12, %p923_p13 }
 0x26b   : > { %p926_p2 = pnand %p925_p1, %p919_p10 }
 0x315   : > { %v488_v23 = vpop.f32.mrf.mxu1 }
 0x316   : > { %492 = vst.msk [vmem:[%s306_s21] sm:$0xff] %vm318_vm1, %v488_v23 }
 0x317   : > { %v722_v24 = vpop.f32.mrf.mxu1 }
 0x318   : > { %929 = shalt.err (!%p926_p2)
}
 0x319   : > { %s930_s23 = scalar_lea.hbm %s1227_s25, 128  ;;  %s934_s13 = scalar_lea.hbm %s1279_s3, 256 }
 0x31a   : > { %p931_p5 = scmp.ne.s32.totalorder %s1227_s25, %s930_s23  ;;  %p935_p8 = scmp.lt.s32.totalorder %s1227_s25, %s1279_s3 }
 0x31b   : > { %p936_p0 = scmp.lt.s32.totalorder %s934_s13, %s930_s23 }
 0x31c   : > { %p932_p6 = pnand %p931_p5, %p1093_p9 }
 0x31d   : > { %p937_p3 = por %p936_p0, %p935_p8 }
 0x31e   : > { %p933_p7 = pneg %p932_p6 }
 0x320   : > { %p938_p4 = pnand %p937_p3, %p933_p7 }
 0x322   : > { %941 = shalt.err (!%p938_p4)
}
 0x323   : > { %729 = dma.vmem_to_hbm [thread:$0]  (%p1093_p9), %s1229_s27, 128, %s1227_s25, %s495_s29  }
 0x324 PF: > { %s540_s8 = sand.u32 1, %s984_s15   ;;  %p1296_p10 = scmp.ge.s32.totalorder %s1004_s20, 2 }
 0x325   : > { %s541_s12 = scalar_lea.sflag [#allocation4], %s540_s8 }
 0x326   : > { %p744_p13 = pnand %p1296_p10, %p1100_p11 }
 0x328   : > { %p745_p12 = pneg %p744_p13 }
 0x32a   : > { %975 = dma.done.wait (%p745_p12), %s541_s12, 128  }
 0x32b   : > { %977 = vsyncadd (%p745_p12), %s541_s12, 4294967168  ;;  %s550_s1 = scalar_lea.sflag [#allocation10], %s540_s8 }
 0x32c   : > { %979 = dma.done.wait (%p745_p12), %s550_s1, 128  }
 0x32d   : > { %981 = vsyncadd (%p745_p12), %s550_s1, 4294967168  ;;  %s27_s20 = sadd.s32 1, %s1004_s20   ;;  %s1297_s28 = sld [smem:[#allocation17_spill]] }
 0x32e   : > { %p24_p1 = scmp.ge.s32.totalorder %s27_s20, 4   ;;  %s1298_s18 = sld [smem:[#allocation15_spill]] }
 0x32f   : > { %s1299_s19 = sld [smem:[#allocation16_spill]]  ;;  %s1300_s15 = smov %s988_s16 }
 0x330   : > { %s1301_s16 = smov %s992_s17  ;;  %26 = sbr.rel (!%p24_p1) target bundleno = 12 (0xc), region = 118 }
 0x333   : > { %s1302_s17 = smov %s1297_s28 }
 0x335   :  { %555 = vsyncpa [#allocation3], 1 }
 0x336   :  { %557 = vsyncpa [#allocation3 + $0x1], 1 }
 0x337   :  { %558 = vsyncpa [#allocation6], 1 }
 0x338   :  { %560 = vsyncpa [#allocation6 + $0x1], 1 }
 0x339   :  { %561 = vsyncpa [#allocation4], 1 }
 0x33a   :  { %563 = vsyncpa [#allocation4 + $0x1], 1 }
 0x33b   :  { %564 = vsyncpa [#allocation10], 1 }
 0x33c   :  { %566 = vsyncpa [#allocation10 + $0x1], 1 }

</bundles_post_ra>
